<compile_context>
chip_gen: v5e
topology: v5e:2x2
jax: 0.10.0
libtpu: 0.0.40
codegen_flags: <defaults>
</compile_context>

<pallas_src>
import jax
import jax.numpy as jnp
from jax.experimental import pallas as pl
from jax.experimental.pallas import tpu as pltpu

_EPS = 1e-5


def _srm_kernel(x_ref, p_ref, o_ref):
    # x_ref: (N, C_TILE, HW)   input tile (any float dtype)
    # p_ref: (C_TILE, 4)       packed params [cfc_mean, cfc_std, bn_gamma, bn_beta]
    # o_ref: (N, C_TILE, HW)   output tile (same dtype as input)
    x = x_ref[...].astype(jnp.float32)
    hw = x.shape[-1]

    # ---- style pooling: per-(n, c) mean / unbiased std over the lane (HW) axis.
    # Two-pass (shifted) form kept for numerical parity with torch.var(); the
    # diff temporary feeds the reduction directly and is never stored back.
    mean = jnp.mean(x, axis=-1, keepdims=True)                      # (N, Ct, 1)
    diff = x - mean
    # NOTE: hw == 1 divides by zero (NaN) exactly like torch's unbiased .var().
    var = jnp.sum(diff * diff, axis=-1, keepdims=True) / (hw - 1)   # unbiased
    std = jnp.sqrt(var + _EPS)                                      # (N, Ct, 1)

    # ---- packed per-channel parameters; keep channel on the sublane axis so
    # broadcasting against the (N, Ct, 1) statistics needs no relayout.
    p = p_ref[...].astype(jnp.float32)                              # (Ct, 4)
    cfc_m = p[:, 0:1]                                               # (Ct, 1)
    cfc_s = p[:, 1:2]
    gamma = p[:, 2:3]
    beta = p[:, 3:4]

    # ---- style integration: z = t_mean*cfc[:,0] + t_std*cfc[:,1]
    z = mean * cfc_m + std * cfc_s                                  # (N, Ct, 1)

    # ---- BatchNorm2d on z (1x1 spatial -> stats over the batch axis, biased var)
    bmean = jnp.mean(z, axis=0, keepdims=True)                      # (1, Ct, 1)
    zc = z - bmean
    bvar = jnp.mean(zc * zc, axis=0, keepdims=True)                 # (1, Ct, 1)
    z_hat = zc * jax.lax.rsqrt(bvar + _EPS) * gamma + beta          # (N, Ct, 1)

    # ---- gate and recalibrate
    g = jax.nn.sigmoid(z_hat)                                       # (N, Ct, 1)
    o_ref[...] = (x * g).astype(o_ref.dtype)


def _pick_c_tile(N, C, HW, itemsize, budget_bytes):
    """Largest channel tile that satisfies the (8,128) block rule and the VMEM budget.

    Block rule: the second-minor block dim (C tile) must be a multiple of 8 or
    equal to the full channel count; the minor dim (HW) is always full-extent.
    """
    cands = [d for d in range(8, C + 1, 8) if C % d == 0]
    if C not in cands:
        cands.append(C)
    bytes_per_channel = N * HW * itemsize
    fits = [d for d in cands if d * bytes_per_channel <= budget_bytes]
    return max(fits) if fits else min(cands)


def srm_layer(x, cfc, bn_gamma, bn_beta, *, c_tile_budget_bytes=4 << 20):
    """x: (N, C, H, W) float. cfc: (C, 2). bn_gamma/bn_beta: (C,)."""
    N, C, H, W = x.shape
    HW = H * W
    # Plain reshape only — HW stays the contiguous lane axis (no transpose).
    xf = x.reshape(N, C, HW)

    # Pack the four per-channel parameter vectors into a single (C, 4) array so
    # each grid step issues one small parameter DMA instead of four.
    params = jnp.stack(
        [cfc[:, 0], cfc[:, 1], bn_gamma, bn_beta], axis=1
    ).astype(jnp.float32)                                           # (C, 4)

    # Conservative per-tile I/O budget: with double-buffered in+out plus the
    # in-kernel f32 temporaries this stays well inside the 48 MiB scoped VMEM
    # limit below (which itself fits v7x's 64 MiB physical VMEM).
    ct = _pick_c_tile(N, C, HW, jnp.dtype(x.dtype).itemsize, c_tile_budget_bytes)
    grid = (C // ct,)

    out = pl.pallas_call(
        _srm_kernel,
        out_shape=jax.ShapeDtypeStruct((N, C, HW), x.dtype),
        grid=grid,
        in_specs=[
            pl.BlockSpec((N, ct, HW), lambda c: (0, c, 0)),
            pl.BlockSpec((ct, 4), lambda c: (c, 0)),
        ],
        out_specs=pl.BlockSpec((N, ct, HW), lambda c: (0, c, 0)),
        compiler_params=pltpu.CompilerParams(
            dimension_semantics=("parallel",),   # independent channel tiles
            vmem_limit_bytes=48 << 20,
        ),
    )(xf, params)
    return out.reshape(N, C, H, W)


def _srm_reference(x, cfc, bn_gamma, bn_beta, eps=_EPS):
    """Pure-JAX reference mirroring the PyTorch module (training-mode BN)."""
    N, C, H, W = x.shape
    xv = x.reshape(N, C, -1)
    mean = xv.mean(axis=2, keepdims=True)
    var = xv.var(axis=2, keepdims=True, ddof=1) + eps
    std = jnp.sqrt(var)
    t = jnp.concatenate([mean, std], axis=2)                 # (N, C, 2)
    z = jnp.sum(t * cfc[None, :, :], axis=2)                 # (N, C)
    bmean = z.mean(axis=0, keepdims=True)
    bvar = z.var(axis=0, keepdims=True)                      # biased
    z_hat = (z - bmean) / jnp.sqrt(bvar + eps) * bn_gamma[None, :] + bn_beta[None, :]
    g = jax.nn.sigmoid(z_hat)
    return x * g[:, :, None, None]


if __name__ == "__main__":
    key = jax.random.PRNGKey(0)
    kx, kc, kg, kb = jax.random.split(key, 4)

    N, C, H, W = 2, 4, 16, 16
    x = jax.random.normal(kx, (N, C, H, W), dtype=jnp.float32)

    # Parameters (shapes per SRMLayer.__init__). The module fills cfc with 0;
    # use deterministic nonzero values so the full kernel path is exercised.
    cfc = 0.1 * jax.random.normal(kc, (C, 2), dtype=jnp.float32)
    bn_gamma = 1.0 + 0.1 * jax.random.normal(kg, (C,), dtype=jnp.float32)
    bn_beta = 0.1 * jax.random.normal(kb, (C,), dtype=jnp.float32)

    out = jax.block_until_ready(srm_layer(x, cfc, bn_gamma, bn_beta))

    ref = _srm_reference(x, cfc, bn_gamma, bn_beta)
    assert out.shape == (N, C, H, W)
    # f32 rounding gets amplified through the tiny-batch BatchNorm (1/sqrt(bvar));
    # 1e-4 is still far tighter than any formula error would produce.
    assert jnp.allclose(out, ref, atol=1e-4, rtol=1e-4), "mismatch vs reference"

    print("KERNEL_OK")
</pallas_src>

<mosaic_0001>
module attributes {stable_mosaic.version = 11 : i64} {
  func.func @_srm_kernel(%arg0: i32, %arg1: memref<2x4x256xf32, #tpu.memory_space<vmem>>, %arg2: memref<4x4xf32, #tpu.memory_space<vmem>>, %arg3: memref<2x4x256xf32, #tpu.memory_space<vmem>>) attributes {dimension_semantics = [#tpu.dimension_semantics<parallel>], iteration_bounds = array<i64: 1>, scalar_prefetch = 0 : i64, scratch_operands = 0 : i64, tpu.core_type = #tpu.core_type<tc>, window_params = [{transform_indices = @transform_0, window_bounds = array<i64: 2, 4, 256>}, {transform_indices = @transform_1, window_bounds = array<i64: 4, 4>}, {transform_indices = @transform_2, window_bounds = array<i64: 2, 4, 256>}]} {
    %c0 = arith.constant 0 : index
    %c0_0 = arith.constant 0 : index
    %c0_1 = arith.constant 0 : index
    %0 = vector.load %arg1[%c0, %c0_0, %c0_1] : memref<2x4x256xf32, #tpu.memory_space<vmem>>, vector<2x4x256xf32>
    %cst = arith.constant dense<0.000000e+00> : vector<2x4xf32>
    %1 = vector.multi_reduction <add>, %0, %cst [2] : vector<2x4x256xf32> to vector<2x4xf32>
    %2 = vector.shape_cast %1 : vector<2x4xf32> to vector<2x4x1xf32>
    %cst_2 = arith.constant 2.560000e+02 : f32
    %3 = vector.broadcast %cst_2 : f32 to vector<2x4x1xf32>
    %4 = arith.divf %2, %3 : vector<2x4x1xf32>
    %5 = vector.broadcast %4 : vector<2x4x1xf32> to vector<2x4x256xf32>
    %6 = arith.subf %0, %5 : vector<2x4x256xf32>
    %7 = arith.mulf %6, %6 : vector<2x4x256xf32>
    %cst_3 = arith.constant dense<0.000000e+00> : vector<2x4xf32>
    %8 = vector.multi_reduction <add>, %7, %cst_3 [2] : vector<2x4x256xf32> to vector<2x4xf32>
    %9 = vector.shape_cast %8 : vector<2x4xf32> to vector<2x4x1xf32>
    %cst_4 = arith.constant 2.550000e+02 : f32
    %10 = vector.broadcast %cst_4 : f32 to vector<2x4x1xf32>
    %11 = arith.divf %9, %10 : vector<2x4x1xf32>
    %cst_5 = arith.constant 9.99999974E-6 : f32
    %12 = vector.broadcast %cst_5 : f32 to vector<2x4x1xf32>
    %13 = arith.addf %11, %12 : vector<2x4x1xf32>
    %14 = math.sqrt %13 : vector<2x4x1xf32>
    %c0_6 = arith.constant 0 : index
    %c0_7 = arith.constant 0 : index
    %15 = vector.load %arg2[%c0_6, %c0_7] : memref<4x4xf32, #tpu.memory_space<vmem>>, vector<4x4xf32>
    %16 = vector.extract_strided_slice %15 {offsets = [0, 0], sizes = [4, 1], strides = [1, 1]} : vector<4x4xf32> to vector<4x1xf32>
    %17 = vector.extract_strided_slice %15 {offsets = [0, 1], sizes = [4, 1], strides = [1, 1]} : vector<4x4xf32> to vector<4x1xf32>
    %18 = vector.extract_strided_slice %15 {offsets = [0, 2], sizes = [4, 1], strides = [1, 1]} : vector<4x4xf32> to vector<4x1xf32>
    %19 = vector.extract_strided_slice %15 {offsets = [0, 3], sizes = [4, 1], strides = [1, 1]} : vector<4x4xf32> to vector<4x1xf32>
    %20 = vector.shape_cast %16 : vector<4x1xf32> to vector<1x4x1xf32>
    %21 = vector.broadcast %20 : vector<1x4x1xf32> to vector<2x4x1xf32>
    %22 = arith.mulf %4, %21 : vector<2x4x1xf32>
    %23 = vector.shape_cast %17 : vector<4x1xf32> to vector<1x4x1xf32>
    %24 = vector.broadcast %23 : vector<1x4x1xf32> to vector<2x4x1xf32>
    %25 = arith.mulf %14, %24 : vector<2x4x1xf32>
    %26 = arith.addf %22, %25 : vector<2x4x1xf32>
    %cst_8 = arith.constant dense<0.000000e+00> : vector<4x1xf32>
    %27 = vector.multi_reduction <add>, %26, %cst_8 [0] : vector<2x4x1xf32> to vector<4x1xf32>
    %28 = vector.shape_cast %27 : vector<4x1xf32> to vector<1x4x1xf32>
    %cst_9 = arith.constant 2.000000e+00 : f32
    %29 = vector.broadcast %cst_9 : f32 to vector<1x4x1xf32>
    %30 = arith.divf %28, %29 : vector<1x4x1xf32>
    %31 = vector.broadcast %30 : vector<1x4x1xf32> to vector<2x4x1xf32>
    %32 = arith.subf %26, %31 : vector<2x4x1xf32>
    %33 = arith.mulf %32, %32 : vector<2x4x1xf32>
    %cst_10 = arith.constant dense<0.000000e+00> : vector<4x1xf32>
    %34 = vector.multi_reduction <add>, %33, %cst_10 [0] : vector<2x4x1xf32> to vector<4x1xf32>
    %35 = vector.shape_cast %34 : vector<4x1xf32> to vector<1x4x1xf32>
    %cst_11 = arith.constant 2.000000e+00 : f32
    %36 = vector.broadcast %cst_11 : f32 to vector<1x4x1xf32>
    %37 = arith.divf %35, %36 : vector<1x4x1xf32>
    %cst_12 = arith.constant 9.99999974E-6 : f32
    %38 = vector.broadcast %cst_12 : f32 to vector<1x4x1xf32>
    %39 = arith.addf %37, %38 : vector<1x4x1xf32>
    %40 = math.rsqrt %39 : vector<1x4x1xf32>
    %41 = vector.broadcast %40 : vector<1x4x1xf32> to vector<2x4x1xf32>
    %42 = arith.mulf %32, %41 : vector<2x4x1xf32>
    %43 = vector.shape_cast %18 : vector<4x1xf32> to vector<1x4x1xf32>
    %44 = vector.broadcast %43 : vector<1x4x1xf32> to vector<2x4x1xf32>
    %45 = arith.mulf %42, %44 : vector<2x4x1xf32>
    %46 = vector.shape_cast %19 : vector<4x1xf32> to vector<1x4x1xf32>
    %47 = vector.broadcast %46 : vector<1x4x1xf32> to vector<2x4x1xf32>
    %48 = arith.addf %45, %47 : vector<2x4x1xf32>
    %49 = arith.negf %48 : vector<2x4x1xf32>
    %50 = math.exp %49 : vector<2x4x1xf32>
    %cst_13 = arith.constant 1.000000e+00 : f32
    %51 = vector.broadcast %cst_13 : f32 to vector<2x4x1xf32>
    %52 = arith.addf %51, %50 : vector<2x4x1xf32>
    %53 = arith.divf %51, %52 : vector<2x4x1xf32>
    %54 = vector.broadcast %53 : vector<2x4x1xf32> to vector<2x4x256xf32>
    %55 = arith.mulf %0, %54 : vector<2x4x256xf32>
    %c0_14 = arith.constant 0 : index
    %c0_15 = arith.constant 0 : index
    %c0_16 = arith.constant 0 : index
    %56 = vector.load %arg3[%c0_14, %c0_15, %c0_16] : memref<2x4x256xf32, #tpu.memory_space<vmem>>, vector<2x4x256xf32>
    tpu.vector_store %arg3[%c0_14, %c0_15, %c0_16], %55 {strides = array<i32>} : memref<2x4x256xf32, #tpu.memory_space<vmem>>, vector<2x4x256xf32>,
    return
  }
  func.func @transform_0(%arg0: i32) -> (i32, i32, i32) {
    %c0_i32 = arith.constant 0 : i32
    %c0_i32_0 = arith.constant 0 : i32
    %c0_i32_1 = arith.constant 0 : i32
    return %c0_i32, %arg0, %c0_i32_0 : i32, i32, i32
  }
  func.func @transform_1(%arg0: i32) -> (i32, i32) {
    %c0_i32 = arith.constant 0 : i32
    %c0_i32_0 = arith.constant 0 : i32
    return %arg0, %c0_i32 : i32, i32
  }
  func.func @transform_2(%arg0: i32) -> (i32, i32, i32) {
    %c0_i32 = arith.constant 0 : i32
    %c0_i32_0 = arith.constant 0 : i32
    %c0_i32_1 = arith.constant 0 : i32
    return %c0_i32, %arg0, %c0_i32_0 : i32, i32, i32
  }
}

</mosaic_0001>

<bundles_post_ra>
// kernel: tpu_custom_call.1
= control target key start
LH: loop header
LB: loop body
LE: loop exit
PB: predicated region body
PF: predicated region fallthrough
CT: control target
= control target key end

     0   :  { %7 = vsyncpa [#allocation3], 0  ;;  %s480_s0 = inlined_call_operand.hbm [shape: f32[2,4,256], index: 0, kind: input, shape index: {}]   ;;  %s481_s1 = inlined_call_operand.hbm [shape: f32[4,4], index: 1, kind: input, shape index: {}]   ;;  %s482_s2 = inlined_call_operand.hbm [shape: f32[2,4,256], index: 2, kind: output, shape index: {}]  }
   0x1   :  { %8 = vsyncpa [#allocation6], 0 }
   0x2   :  { %9 = vsyncpa [#allocation4], 0  ;;  %s14_s11 = sshll.u32 %s480_s0, 4  ;;  %s405_s12 = smov [#allocation2]   ;;  %s15_s11 = int_to_ptr.hbm [resolvable:$true] %s14_s11 }
   0x3   :  { %s16_s13 = sshll.u32 %s405_s12, 4  ;;  %s28_s16 = sshll.u32 %s481_s1, 4  ;;  %s17_s13 = int_to_ptr.vmem [resolvable:$true] %s16_s13  ;;  %s29_s16 = int_to_ptr.hbm [resolvable:$true] %s28_s16 }
   0x4   :  { %s406_s17 = smov 128   ;;  %s407_s18 = smov 8  }
   0x5   :  { %22 = dma.hbm_to_vmem [thread:$0]  %s15_s11, 256, %s17_s13, [#allocation3], %s406_s17, %s406_s17, %s407_s18  }
   0x6   :  { %s408_s19 = smov [#allocation5]  }
   0x7   :  { %s30_s20 = sshll.u32 %s408_s19, 4  ;;  %s31_s20 = int_to_ptr.vmem [resolvable:$true] %s30_s20 }
   0x8   :  { %33 = dma.hbm_to_vmem [thread:$0]  %s29_s16, 64, %s31_s20, [#allocation6]  }
   0x9   :  { %399 = dma.done.wait [#allocation3], 256  }
   0xa   :  { %400 = vsyncadd [#allocation3], 4294967040 }
   0xb   :  { %401 = dma.done.wait [#allocation6], 64  }
   0xc   :  { %402 = vsyncadd [#allocation6], 4294967232  ;;  %v442_v0 = vld [vmem:[#allocation2] sm:$0xff]  ;;  %v444_v1 = vld [vmem:[#allocation2 + $0x8] sm:$0xff]  ;;  %vm57_vm0 = vcmask 1043456   ;;  %v409_v12 = vmov 256.0  }
   0xd   :  { %46 = vst [vmem:[#allocation1] ss:$2 sm:$0xff] %v442_v0  ;;  %307 = vrcp.f32 %v409_v12  ;;  %v410_v18 = vmov 839922192   ;;  %v151_v42 = vld [vmem:[#allocation5] sm:$0xf] }
   0xe   :  { %50 = vst [vmem:[#allocation1 + $0x10] ss:$2 sm:$0xff] %v444_v1  ;;  %v80_v19 = vunpack.c.l.s4 %v410_v18  ;;  %s411_s0 = smov 126   ;;  %s412_s1 = smov 125   ;;  %v413_v43 = vmov 255.0   ;;  %vm166_vm7 = vcmask 3072  }
   0xf   :  { %309 = vrcp.f32 %v413_v43  ;;  %s414_s21 = smov 127   ;;  %s417_s22 = smov [#allocation7]  }
  0x10   :  { %v452_v21 = vunpack.c.0.s8 %v80_v19  ;;  %s274_s23 = sshll.u32 %s417_s22, 4  ;;  %s276_s26 = sshll.u32 %s482_s2, 4  ;;  %s275_s23 = int_to_ptr.vmem [resolvable:$true] %s274_s23  ;;  %s277_s26 = int_to_ptr.hbm [resolvable:$true] %s276_s26 }
  0x13   :  { %v308_v13 = vpop.eup %307 }
  0x14   :  { %v47_v2 = vld.sshfl [vmem:[#allocation1] sm:$0xff pattern:$0x75316420]  ;;  %v48_v3 = vld.sshfl [vmem:[#allocation1 + $0x8] sm:$0xff pattern:$0x75316420]  ;;  %vm73_vm1 = vweird.f32 %v308_v13 }
  0x15   :  { %v58_v4 = vsel %vm57_vm0, %v47_v2, 0.0  ;;  %v59_v5 = vsel %vm57_vm0, %v48_v3, 0.0  ;;  %v51_v7 = vld.sshfl [vmem:[#allocation1 + $0x10] sm:$0xff pattern:$0x75316420]  ;;  %v69_v14 = vmul.f32 256.0, %v308_v13  ;;  %v310_v44 = vpop.eup %309 }
  0x16   :  { %v60_v6 = vadd.f32 %v59_v5, %v58_v4  ;;  %v52_v8 = vld.sshfl [vmem:[#allocation1 + $0x18] sm:$0xff pattern:$0x75316420]  ;;  %v63_v9 = vsel %vm57_vm0, %v51_v7, 0.0  ;;  %v117_v45 = vmul.f32 255.0, %v310_v44  ;;  %vm121_vm2 = vweird.f32 %v310_v44 }
  0x17   :  { %v64_v10 = vsel %vm57_vm0, %v52_v8, 0.0  ;;  %v70_v15 = vsub.f32 1.0, %v69_v14 }
  0x18   :  { %61 = vadd.xlane.f32.xlu0 %v60_v6  ;;  %v65_v11 = vadd.f32 %v64_v10, %v63_v9  ;;  %v118_v46 = vsub.f32 1.0, %v117_v45 }
  0x19   :  { %v71_v16 = vmul.f32 %v308_v13, %v70_v15 }
  0x1a   :  { %v119_v47 = vmul.f32 %v310_v44, %v118_v46 }
  0x1b   :  { %v72_v17 = vadd.f32 %v308_v13, %v71_v16  ;;  %v415_v16 = vmov 2.0  }
  0x1c   :  { %v120_v48 = vadd.f32 %v310_v44, %v119_v47 }
  0x1d   :  { %v74_v20 = vsel %vm73_vm1, %v308_v13, %v72_v17 }
  0x1e   :  { %v122_v49 = vsel %vm121_vm2, %v310_v44, %v120_v48 }
  0x20   :  { %66 = vadd.xlane.f32.xlu0 %v65_v11 }
  0x34   :  { %200 = vrot.lane.b32.xlu0 %v151_v42, %s411_s0 }
  0x8b   :  { %v62_v22 = vpop.xlane.xlu0 %61 }
  0x8c   :  { %v454_v23 = vmul.f32 %v74_v20, %v62_v22 }
  0x8e   :  { %v82_v24 = vperm.slane %v454_v23, %v452_v21 }
  0x90   :  { %v89_v25 = vsub.f32 %v442_v0, %v82_v24  ;;  %v152_v24 = vmul.f32 %v151_v42, %v454_v23 }
  0x92   :  { %v91_v26 = vmul.f32 %v89_v25, %v89_v25 }
  0x93   :  { %v67_v27 = vpop.xlane.xlu0 %66 }
  0x94   :  { %95 = vst [vmem:[#allocation1] ss:$2 sm:$0xff] %v91_v26  ;;  %v459_v28 = vmul.f32 %v74_v20, %v67_v27 }
  0x96   :  { %v86_v29 = vperm.slane %v459_v28, %v452_v21  ;;  %v153_v26 = vmul.f32 %v151_v42, %v459_v28  ;;  %v416_v28 = vmov 0  }
  0x97   :  { %305 = vset.pattern.permute.xlu2 %v416_v28  ;;  %306 = vset.pattern.permute.xlu0 %v416_v28 }
  0x98   :  { %v90_v30 = vsub.f32 %v444_v1, %v86_v29 }
  0x9a   :  { %v92_v31 = vmul.f32 %v90_v30, %v90_v30 }
  0x9b   :  { %v96_v32 = vld.sshfl [vmem:[#allocation1] sm:$0xff pattern:$0x75316420]  ;;  %v97_v33 = vld.sshfl [vmem:[#allocation1 + $0x8] sm:$0xff pattern:$0x75316420] }
  0x9c   :  { %99 = vst [vmem:[#allocation1 + $0x10] ss:$2 sm:$0xff] %v92_v31  ;;  %v106_v34 = vsel %vm57_vm0, %v96_v32, 0.0  ;;  %v107_v35 = vsel %vm57_vm0, %v97_v33, 0.0 }
  0x9d   :  { %v108_v36 = vadd.f32 %v107_v35, %v106_v34 }
  0x9f   :  { %109 = vadd.xlane.f32.xlu1 %v108_v36 }
  0xa3   :  { %v100_v37 = vld.sshfl [vmem:[#allocation1 + $0x10] sm:$0xff pattern:$0x75316420]  ;;  %v101_v38 = vld.sshfl [vmem:[#allocation1 + $0x18] sm:$0xff pattern:$0x75316420] }
  0xa4   :  { %v111_v39 = vsel %vm57_vm0, %v100_v37, 0.0  ;;  %v112_v40 = vsel %vm57_vm0, %v101_v38, 0.0 }
  0xa5   :  { %v113_v41 = vadd.f32 %v112_v40, %v111_v39 }
  0xa7   :  { %114 = vadd.xlane.f32.xlu1 %v113_v41 }
  0xc0   :  { %205 = vrot.lane.b32.xlu1 %v151_v42, %s412_s1 }
 0x112   :  { %v110_v50 = vpop.xlane.xlu1 %109 }
 0x113   :  { %v123_v51 = vmul.f32 %v122_v49, %v110_v50 }
 0x115   :  { %v125_v52 = vadd.f32 1e-05, %v123_v51  ;;  %v201_v51 = vpop.permute.xlu0 %200 }
 0x117   :  { %311 = vrsqrt.f32 %v125_v52  ;;  %vm134_vm3 = vcmp.eq.f32.partialorder %v125_v52, inf  ;;  %v137_v4 = vand.u32 2147483648, %v125_v52  ;;  %vm136_vm4 = vcmp.eq.f32.partialorder %v125_v52, 0.0 }
 0x11a   :  { %v115_v53 = vpop.xlane.xlu1 %114 }
 0x11b   :  { %v124_v54 = vmul.f32 %v122_v49, %v115_v53 }
 0x11d   :  { %v312_v55 = vpop.eup %311  ;;  %v126_v56 = vadd.f32 1e-05, %v124_v54 }
 0x11e   :  { %v128_v57 = vmul.f32 %v312_v55, %v125_v52 }
 0x11f   :  { %313 = vrsqrt.f32 %v126_v56  ;;  %vm146_vm5 = vcmp.eq.f32.partialorder %v126_v56, inf  ;;  %v149_v12 = vand.u32 2147483648, %v126_v56  ;;  %vm148_vm6 = vcmp.eq.f32.partialorder %v126_v56, 0.0 }
 0x120   :  { %v129_v58 = vmul.f32 %v312_v55, %v128_v57  ;;  %315 = vrcp.f32 %v415_v16 }
 0x122   :  { %v130_v59 = vmul.f32 0.5, %v129_v58 }
 0x124   :  { %v131_v60 = vsub.f32 1.5, %v130_v59 }
 0x125   :  { %v314_v61 = vpop.eup %313 }
 0x126   :  { %v132_v62 = vmul.f32 %v312_v55, %v131_v60  ;;  %v140_v63 = vmul.f32 %v314_v61, %v126_v56  ;;  %v316_v17 = vpop.eup %315 }
 0x127   :  { %v171_v18 = vmul.f32 2.0, %v316_v17  ;;  %vm175_vm8 = vweird.f32 %v316_v17 }
 0x128   :  { %v133_v2 = vmul.f32 %v132_v62, %v125_v52  ;;  %v141_v3 = vmul.f32 %v314_v61, %v140_v63 }
 0x129   :  { %v172_v19 = vsub.f32 1.0, %v171_v18 }
 0x12a   :  { %v135_v5 = vsel %vm134_vm3, %v125_v52, %v133_v2  ;;  %v142_v6 = vmul.f32 0.5, %v141_v3 }
 0x12b   :  { %v138_v7 = vsel %vm136_vm4, %v137_v4, %v135_v5  ;;  %v173_v22 = vmul.f32 %v316_v17, %v172_v19 }
 0x12c   :  { %v154_v8 = vmul.f32 %v151_v42, %v138_v7  ;;  %v143_v9 = vsub.f32 1.5, %v142_v6 }
 0x12d   :  { %v174_v27 = vadd.f32 %v316_v17, %v173_v22 }
 0x12e   :  { %158 = vrot.lane.b32.xlu2 %v154_v8, %s414_s21  ;;  %v144_v10 = vmul.f32 %v314_v61, %v143_v9 }
 0x12f   :  { %v176_v32 = vsel %vm175_vm8, %v316_v17, %v174_v27 }
 0x130   :  { %v145_v11 = vmul.f32 %v144_v10, %v126_v56 }
 0x132   :  { %v147_v13 = vsel %vm146_vm5, %v126_v56, %v145_v11  ;;  %v206_v54 = vpop.permute.xlu1 %205 }
 0x133   :  { %v150_v14 = vsel %vm148_vm6, %v149_v12, %v147_v13 }
 0x134   :  { %v155_v15 = vmul.f32 %v151_v42, %v150_v14 }
 0x136   :  { %160 = vrot.lane.b32.xlu2 %v155_v15, %s414_s21 }
 0x188   :  { %v159_v20 = vpop.permute.xlu2 %158 }
 0x189   :  { %v164_v25 = vadd.f32 %v159_v20, %v152_v24 }
 0x18b   :  { %v167_v31 = vsel %vm166_vm7, %v164_v25, 0.0 }
 0x190   :  { %v161_v29 = vpop.permute.xlu2 %160 }
 0x191   :  { %v165_v30 = vadd.f32 %v161_v29, %v153_v26 }
 0x193   :  { %v168_v33 = vsel %vm166_vm7, %v165_v30, 0.0 }
 0x194   :  { %v169_v34 = vadd.f32 %v168_v33, %v167_v31 }
 0x196   :  { %v177_v35 = vmul.f32 %v176_v32, %v169_v34 }
 0x198   :  { %v179_v36 = vsub.f32 %v165_v30, %v177_v35  ;;  %v178_v37 = vsub.f32 %v164_v25, %v177_v35 }
 0x19a   :  { %v181_v38 = vmul.f32 %v179_v36, %v179_v36  ;;  %v180_v39 = vmul.f32 %v178_v37, %v178_v37 }
 0x19c   :  { %v183_v40 = vsel %vm166_vm7, %v181_v38, 0.0  ;;  %v182_v41 = vsel %vm166_vm7, %v180_v39, 0.0 }
 0x19d   :  { %v184_v23 = vadd.f32 %v183_v40, %v182_v41 }
 0x19f   :  { %v185_v43 = vmul.f32 %v184_v23, %v176_v32 }
 0x1a1   :  { %v186_v44 = vadd.f32 1e-05, %v185_v43 }
 0x1a3   :  { %317 = vrsqrt.f32 %v186_v44  ;;  %vm193_vm10 = vweird.f32 %v186_v44 }
 0x1a9   :  { %v318_v42 = vpop.eup %317 }
 0x1aa   :  { %v188_v45 = vmul.f32 %v318_v42, %v186_v44  ;;  %vm194_vm9 = vweird.f32 %v318_v42 }
 0x1ab   :  { %vm195_vm11 = vmor %vm193_vm10, %vm194_vm9 }
 0x1ac   :  { %v189_v46 = vmul.f32 %v318_v42, %v188_v45 }
 0x1ae   :  { %v190_v47 = vmul.f32 0.5, %v189_v46 }
 0x1b0   :  { %v191_v48 = vsub.f32 1.5, %v190_v47 }
 0x1b2   :  { %v192_v49 = vmul.f32 %v318_v42, %v191_v48 }
 0x1b4   :  { %v196_v50 = vsel %vm195_vm11, %v318_v42, %v192_v49 }
 0x1b5   :  { %v197_v52 = vmul.f32 %v196_v50, %v178_v37  ;;  %v198_v53 = vmul.f32 %v196_v50, %v179_v36 }
 0x1b7   :  { %v203_v55 = vmul.f32 %v201_v51, %v197_v52  ;;  %v204_v56 = vmul.f32 %v201_v51, %v198_v53 }
 0x1b9   :  { %v208_v57 = vadd.f32 %v206_v54, %v203_v55  ;;  %v209_v58 = vadd.f32 %v206_v54, %v204_v56 }
 0x1bb   :  { %v290_v59 = vmul.f32 -1.442695, %v208_v57  ;;  %v291_v60 = vmul.f32 -1.442695, %v209_v58 }
 0x1bd   :  { %319 = vpow2.f32 %v290_v59 }
 0x1be   :  { %321 = vpow2.f32 %v291_v60 }
 0x1c3   :  { %v320_v61 = vpop.eup %319 }
 0x1c4   :  { %v322_v62 = vpop.eup %321  ;;  %v216_v63 = vadd.f32 1.0, %v320_v61 }
 0x1c5   :  { %v217_v2 = vadd.f32 1.0, %v322_v62 }
 0x1c6   :  { %323 = vrcp.f32 %v216_v63  ;;  %v229_v8 = vand.u32 2147483648, %v216_v63  ;;  %v227_v11 = vand.u32 2147483647, %v216_v63  ;;  %vm223_vm13 = vweird.f32 %v216_v63 }
 0x1c7   :  { %325 = vrcp.f32 %v217_v2  ;;  %v244_v18 = vand.u32 2147483648, %v217_v2  ;;  %vm238_vm1 = vweird.f32 %v217_v2  ;;  %v242_v19 = vand.u32 2147483647, %v217_v2 }
 0x1c8   :  { %v230_v14 = vor.u32 1.1754944e-38, %v229_v8  ;;  %vm228_vm15 = vcmp.eq.f32.partialorder %v227_v11, 8.507059e+37 }
 0x1c9   :  { %v245_v22 = vor.u32 1.1754944e-38, %v244_v18  ;;  %vm243_vm3 = vcmp.eq.f32.partialorder %v242_v19, 8.507059e+37 }
 0x1cc   :  { %v324_v3 = vpop.eup %323 }
 0x1cd   :  { %v326_v4 = vpop.eup %325  ;;  %v219_v5 = vmul.f32 %v324_v3, %v216_v63  ;;  %vm224_vm12 = vweird.f32 %v324_v3 }
 0x1ce   :  { %v234_v6 = vmul.f32 %v326_v4, %v217_v2  ;;  %vm225_vm14 = vmor %vm223_vm13, %vm224_vm12  ;;  %vm239_vm0 = vweird.f32 %v326_v4 }
 0x1cf   :  { %v220_v7 = vsub.f32 1.0, %v219_v5  ;;  %vm240_vm2 = vmor %vm238_vm1, %vm239_vm0 }
 0x1d0   :  { %v235_v9 = vsub.f32 1.0, %v234_v6 }
 0x1d1   :  { %v221_v10 = vmul.f32 %v324_v3, %v220_v7 }
 0x1d2   :  { %v236_v13 = vmul.f32 %v326_v4, %v235_v9 }
 0x1d3   :  { %v222_v12 = vadd.f32 %v324_v3, %v221_v10 }
 0x1d4   :  { %v237_v17 = vadd.f32 %v326_v4, %v236_v13 }
 0x1d5   :  { %v226_v15 = vsel %vm225_vm14, %v324_v3, %v222_v12 }
 0x1d6   :  { %v231_v16 = vsel %vm228_vm15, %v230_v14, %v226_v15  ;;  %v241_v20 = vsel %vm240_vm2, %v326_v4, %v237_v17 }
 0x1d7   :  { %250 = vperm.xlu2 %305, %v231_v16   ;;  %v246_v24 = vsel %vm243_vm3, %v245_v22, %v241_v20 }
 0x1df   :  { %254 = vperm.xlu2 %305, %v246_v24  }
 0x231   :  { %v251_v25 = vpop.permute.xlu2 %250 }
 0x232   :  { %v259_v26 = vperm.slane %v251_v25, %v452_v21 }
 0x234   :  { %v266_v27 = vmul.f32 %v259_v26, %v442_v0 }
 0x236   :  { %268 = vst [vmem:[#allocation7] sm:$0xff] %v266_v27 }
 0x239   :  { %v255_v29 = vpop.permute.xlu2 %254 }
 0x23a   :  { %v263_v30 = vperm.slane %v255_v29, %v452_v21 }
 0x23c   :  { %v267_v31 = vmul.f32 %v263_v30, %v444_v1 }
 0x23e   :  { %269 = vst [vmem:[#allocation7 + $0x8] sm:$0xff] %v267_v31 }
 0x23f   :  { %282 = dma.vmem_to_hbm [thread:$0]  %s275_s23, 256, %s277_s26, [#allocation4], %s406_s17, %s406_s17, %s407_s18  }
 0x240   :  { %403 = dma.done.wait [#allocation4], 256  }
 0x241   :  { %404 = vsyncadd [#allocation4], 4294967040 }
 0x242   :  { %287 = vsyncpa [#allocation3], 1 }
 0x243   :  { %288 = vsyncpa [#allocation6], 1 }
 0x244   :  { %289 = vsyncpa [#allocation4], 1 }

</bundles_post_ra>
